<compile_context>
chip_gen: v5e
topology: v5e:2x2
jax: 0.10.0
libtpu: 0.0.40
codegen_flags: <defaults>
</compile_context>

<pallas_src>
import jax
import jax.numpy as jnp
import numpy as np
from jax.experimental import pallas as pl
from jax.experimental.pallas import tpu as pltpu


def _pick_bt(batch: int) -> int:
    """Images folded into the lane axis per grid step (divisor of batch, <=8).

    Prefer the largest fold that still leaves >= 2 grid steps, so both v7x
    TensorCores get work while per-step overhead is amortized.
    """
    cands = [d for d in range(1, min(batch, 8) + 1)
             if batch % d == 0 and batch // d >= 2]
    return max(cands) if cands else 1


def _make_kernel(W, L, Cin, Cup):
    """Fused Upsample kernel: deconv + concat + two 3x3 conv+ReLU, all in VMEM."""
    # Tap offsets in the flattened (row-major) per-image index.
    offs = [(dh - 1) * W + (dw - 1) for dh in range(3) for dw in range(3)]

    def conv3x3(src, masks, w, b):
        # 3x3 'same' conv as ONE stacked-K GEMM: (Cout, 9*Csrc) @ (9*Csrc, L).
        taps = []
        for t, off in enumerate(offs):
            if off == 0:
                p = src                                   # center tap: no mask
            else:
                p = pltpu.roll(src, (-off) % L, axis=1)   # XLU shift, no copies
                p = p * masks[t:t + 1, :]                 # zero 'same' padding
            taps.append(p)
        patch = jnp.concatenate(taps, axis=0)             # (9*Csrc, L)
        y = jnp.dot(w, patch, preferred_element_type=jnp.float32)
        return jnp.maximum(y + b, 0.0)                    # bias + ReLU

    def kernel(x1_ref, z_ref, masks_ref, wlane_ref, upb_ref,
               w1_ref, b1_ref, w2_ref, b2_ref, o_ref):
        x1 = x1_ref[0]                # (Cskip, L) skip connection
        z = z_ref[0]                  # (Cin, L)  NN-2x-upsampled x_0
        masks = masks_ref[...]        # (9, L)   boundary masks, loaded once
        wlane = wlane_ref[...]        # (Cup*Cin, L) parity deconv weights

        # ConvTranspose2d(k=2, s=2): parity-dependent pointwise contraction
        # over the replicated x_0 (pure VPU FMAs; no scatter, no shuffle).
        up_rows = []
        for u in range(Cup):
            acc = wlane[u * Cin:u * Cin + 1, :] * z[0:1, :]
            for k in range(1, Cin):
                acc = acc + wlane[u * Cin + k:u * Cin + k + 1, :] * z[k:k + 1, :]
            up_rows.append(acc + upb_ref[u:u + 1, :])

        # Channel concat [x_1, up] never touches HBM.
        src1 = jnp.concatenate([x1] + up_rows, axis=0)     # (Cin, L)

        h1 = conv3x3(src1, masks, w1_ref[...], b1_ref[...])   # (Cout, L)
        h2 = conv3x3(h1, masks, w2_ref[...], b2_ref[...])     # (Cout, L)
        o_ref[0] = h2.astype(o_ref.dtype)

    return kernel


def upsample_forward(x0_nchw, x1_nchw, params):
    """Upsample forward.  x0: (B, Cin, H/2, W/2), x1: (B, Cin - Cin//2, H, W)."""
    B, Cin, Hh, Wh = x0_nchw.shape
    Bx, Cskip, H, W = x1_nchw.shape
    assert Bx == B and H == 2 * Hh and W == 2 * Wh
    Cup = params["up_w"].shape[1]
    assert Cskip + Cup == Cin
    Cout = params["conv1_w"].shape[0]
    N = H * W

    Bt = _pick_bt(B)
    nb = B // Bt
    L = Bt * N
    f32 = jnp.float32

    # ---- activations: layout plumbing only (batch folded into lane axis) ----
    x1f = (x1_nchw.reshape(nb, Bt, Cskip, N)
           .transpose(0, 2, 1, 3).reshape(nb, Cskip, L).astype(f32))
    # Nearest-neighbour 2x replication of x_0 (layout only; deconv math stays
    # in-kernel as the parity-weighted contraction below).
    z = jnp.repeat(jnp.repeat(x0_nchw, 2, axis=2), 2, axis=3)      # (B,Cin,H,W)
    zf = (z.reshape(nb, Bt, Cin, N)
          .transpose(0, 2, 1, 3).reshape(nb, Cin, L).astype(f32))

    # ---- constants (tiny, shape/param-dependent; folded under jit) ----------
    pos = jnp.arange(N)
    row, col = pos // W, pos % W
    mask_list = []
    for dh in range(3):
        for dw in range(3):
            ok = ((row + dh - 1 >= 0) & (row + dh - 1 < H) &
                  (col + dw - 1 >= 0) & (col + dw - 1 < W))
            mask_list.append(ok)
    masks = jnp.tile(jnp.stack(mask_list).astype(f32), (1, Bt))     # (9, L)

    # ConvTranspose weight (Cin, Cup, 2, 2) -> parity-dependent lane weights:
    # wlane[u*Cin+k, n] = up_w[k, u, row(n)%2, col(n)%2].
    wl = params["up_w"][:, :, row % 2, col % 2]                     # (Cin,Cup,N)
    wlane = jnp.tile(jnp.transpose(wl, (1, 0, 2)).reshape(Cup * Cin, N),
                     (1, Bt)).astype(f32)                           # (Cup*Cin,L)
    upb = params["up_b"].reshape(Cup, 1).astype(f32)

    # 3x3 weights (OIHW) -> stacked-K matrices (Cout, 9*Csrc), tap-major, with
    # input-channel order matching cat([x_1, up], dim=1).
    w1 = jnp.transpose(params["conv1_w"], (0, 2, 3, 1)).reshape(Cout, 9 * Cin).astype(f32)
    b1 = params["conv1_b"].reshape(Cout, 1).astype(f32)
    w2 = jnp.transpose(params["conv2_w"], (0, 2, 3, 1)).reshape(Cout, 9 * Cout).astype(f32)
    b2 = params["conv2_b"].reshape(Cout, 1).astype(f32)

    kernel = _make_kernel(W, L, Cin, Cup)

    blk3d = lambda b: (b, 0, 0)
    const2d = lambda b: (0, 0)

    flops = 2 * B * N * (Cup * Cin + 9 * Cin * Cout + 9 * Cout * Cout)
    bytes_accessed = 4 * (x1f.size + zf.size + masks.size + wlane.size + upb.size
                          + nb * (w1.size + b1.size + w2.size + b2.size)
                          + B * Cout * N)

    # VMEM sizing from the actual buffers (activations, constants, patch
    # temporaries, double buffering) with generous headroom; well under every
    # chip's physical VMEM (v7x: 64 MiB).
    per_step = 4 * L * (Cskip + Cin + Cout + 9 + Cup * Cin + 9 * Cin + 9 * Cout + Cout)
    vmem_limit = int(min(32 * 1024 * 1024, max(8 * 1024 * 1024, 16 * per_step)))

    out = pl.pallas_call(
        kernel,
        out_shape=jax.ShapeDtypeStruct((nb, Cout, L), x1_nchw.dtype),
        grid=(nb,),
        in_specs=[
            pl.BlockSpec((1, Cskip, L), blk3d),
            pl.BlockSpec((1, Cin, L), blk3d),
            pl.BlockSpec(masks.shape, const2d),
            pl.BlockSpec(wlane.shape, const2d),
            pl.BlockSpec(upb.shape, const2d),
            pl.BlockSpec(w1.shape, const2d),
            pl.BlockSpec(b1.shape, const2d),
            pl.BlockSpec(w2.shape, const2d),
            pl.BlockSpec(b2.shape, const2d),
        ],
        out_specs=pl.BlockSpec((1, Cout, L), blk3d),
        compiler_params=pltpu.CompilerParams(
            dimension_semantics=("parallel",),
            vmem_limit_bytes=vmem_limit),
        cost_estimate=pl.CostEstimate(flops=flops, transcendentals=0,
                                      bytes_accessed=bytes_accessed),
    )(x1f, zf, masks, wlane, upb, w1, b1, w2, b2)

    # Unfold the lane axis back to NCHW (layout plumbing only).
    out = out.reshape(nb, Cout, Bt, N).transpose(0, 2, 1, 3).reshape(B, Cout, H, W)
    return out


# -----------------------------------------------------------------------------
# Pure-JAX reference (correctness check only)
# -----------------------------------------------------------------------------
def upsample_reference(x0, x1, p):
    B, _, Hh, Wh = x0.shape
    Cup = p["up_w"].shape[1]
    up = jnp.einsum("bkij,koac->boiajc", x0, p["up_w"]).reshape(B, Cup, 2 * Hh, 2 * Wh)
    up = up + p["up_b"][None, :, None, None]
    x = jnp.concatenate([x1, up], axis=1)
    for wk, bk in (("conv1_w", "conv1_b"), ("conv2_w", "conv2_b")):
        x = jax.lax.conv_general_dilated(
            x, p[wk], (1, 1), "SAME",
            dimension_numbers=("NCHW", "OIHW", "NCHW")) + p[bk][None, :, None, None]
        x = jnp.maximum(x, 0.0)
    return x


if __name__ == "__main__":
    in_channels, out_channels = 4, 8
    B, H, W = 2, 16, 16
    c_up = in_channels // 2                   # ConvTranspose output channels
    c_skip = in_channels - in_channels // 2   # x_1 channels

    key = jax.random.PRNGKey(0)
    ks = jax.random.split(key, 8)
    params = {
        # torch layouts
        "up_w": jax.random.normal(ks[0], (in_channels, c_up, 2, 2), jnp.float32) * 0.2,
        "up_b": jax.random.normal(ks[1], (c_up,), jnp.float32) * 0.1,
        "conv1_w": jax.random.normal(ks[2], (out_channels, in_channels, 3, 3), jnp.float32) * 0.2,
        "conv1_b": jax.random.normal(ks[3], (out_channels,), jnp.float32) * 0.1,
        "conv2_w": jax.random.normal(ks[4], (out_channels, out_channels, 3, 3), jnp.float32) * 0.2,
        "conv2_b": jax.random.normal(ks[5], (out_channels,), jnp.float32) * 0.1,
    }

    x0 = jax.random.normal(ks[6], (B, in_channels, H // 2, W // 2), jnp.float32)
    x1 = jax.random.normal(ks[7], (B, c_skip, H, W), jnp.float32)

    fwd = jax.jit(upsample_forward)
    out = jax.block_until_ready(fwd(x0, x1, params))
    ref = jax.block_until_ready(upsample_reference(x0, x1, params))

    assert out.shape == (B, out_channels, H, W), out.shape
    np.testing.assert_allclose(np.asarray(out), np.asarray(ref), rtol=1e-4, atol=1e-4)
    print("KERNEL_OK")
</pallas_src>

<mosaic_0001>
module attributes {stable_mosaic.version = 11 : i64} {
  func.func @kernel(%arg0: i32, %arg1: memref<1x2x256xf32, #tpu.memory_space<vmem>>, %arg2: memref<1x4x256xf32, #tpu.memory_space<vmem>>, %arg3: memref<9x256xf32, #tpu.memory_space<vmem>>, %arg4: memref<8x256xf32, #tpu.memory_space<vmem>>, %arg5: memref<2x1xf32, #tpu.memory_space<vmem>>, %arg6: memref<8x36xf32, #tpu.memory_space<vmem>>, %arg7: memref<8x1xf32, #tpu.memory_space<vmem>>, %arg8: memref<8x72xf32, #tpu.memory_space<vmem>>, %arg9: memref<8x1xf32, #tpu.memory_space<vmem>>, %arg10: memref<1x8x256xf32, #tpu.memory_space<vmem>>) attributes {dimension_semantics = [#tpu.dimension_semantics<parallel>], iteration_bounds = array<i64: 2>, scalar_prefetch = 0 : i64, scratch_operands = 0 : i64, tpu.core_type = #tpu.core_type<tc>, window_params = [{transform_indices = @transform_0, window_bounds = array<i64: 1, 2, 256>}, {transform_indices = @transform_1, window_bounds = array<i64: 1, 4, 256>}, {pipeline_mode = #tpu.pipeline_mode<synchronous>, transform_indices = @transform_2, window_bounds = array<i64: 9, 256>}, {pipeline_mode = #tpu.pipeline_mode<synchronous>, transform_indices = @transform_3, window_bounds = array<i64: 8, 256>}, {pipeline_mode = #tpu.pipeline_mode<synchronous>, transform_indices = @transform_4, window_bounds = array<i64: 2, 1>}, {pipeline_mode = #tpu.pipeline_mode<synchronous>, transform_indices = @transform_5, window_bounds = array<i64: 8, 36>}, {pipeline_mode = #tpu.pipeline_mode<synchronous>, transform_indices = @transform_6, window_bounds = array<i64: 8, 1>}, {pipeline_mode = #tpu.pipeline_mode<synchronous>, transform_indices = @transform_7, window_bounds = array<i64: 8, 72>}, {pipeline_mode = #tpu.pipeline_mode<synchronous>, transform_indices = @transform_8, window_bounds = array<i64: 8, 1>}, {transform_indices = @transform_9, window_bounds = array<i64: 1, 8, 256>}]} {
    %c0 = arith.constant 0 : index
    %c0_0 = arith.constant 0 : index
    %c0_1 = arith.constant 0 : index
    %0 = vector.load %arg1[%c0, %c0_0, %c0_1] : memref<1x2x256xf32, #tpu.memory_space<vmem>>, vector<1x2x256xf32>
    %1 = vector.shape_cast %0 : vector<1x2x256xf32> to vector<2x256xf32>
    %c0_2 = arith.constant 0 : index
    %c0_3 = arith.constant 0 : index
    %c0_4 = arith.constant 0 : index
    %2 = vector.load %arg2[%c0_2, %c0_3, %c0_4] : memref<1x4x256xf32, #tpu.memory_space<vmem>>, vector<1x4x256xf32>
    %3 = vector.shape_cast %2 : vector<1x4x256xf32> to vector<4x256xf32>
    %c0_5 = arith.constant 0 : index
    %c0_6 = arith.constant 0 : index
    %4 = vector.load %arg3[%c0_5, %c0_6] : memref<9x256xf32, #tpu.memory_space<vmem>>, vector<9x256xf32>
    %c0_7 = arith.constant 0 : index
    %c0_8 = arith.constant 0 : index
    %5 = vector.load %arg4[%c0_7, %c0_8] : memref<8x256xf32, #tpu.memory_space<vmem>>, vector<8x256xf32>
    %6 = vector.extract_strided_slice %5 {offsets = [0, 0], sizes = [1, 256], strides = [1, 1]} : vector<8x256xf32> to vector<1x256xf32>
    %7 = vector.extract_strided_slice %3 {offsets = [0, 0], sizes = [1, 256], strides = [1, 1]} : vector<4x256xf32> to vector<1x256xf32>
    %8 = arith.mulf %6, %7 : vector<1x256xf32>
    %9 = vector.extract_strided_slice %5 {offsets = [1, 0], sizes = [1, 256], strides = [1, 1]} : vector<8x256xf32> to vector<1x256xf32>
    %10 = vector.extract_strided_slice %3 {offsets = [1, 0], sizes = [1, 256], strides = [1, 1]} : vector<4x256xf32> to vector<1x256xf32>
    %11 = arith.mulf %9, %10 : vector<1x256xf32>
    %12 = arith.addf %8, %11 : vector<1x256xf32>
    %13 = vector.extract_strided_slice %5 {offsets = [2, 0], sizes = [1, 256], strides = [1, 1]} : vector<8x256xf32> to vector<1x256xf32>
    %14 = vector.extract_strided_slice %3 {offsets = [2, 0], sizes = [1, 256], strides = [1, 1]} : vector<4x256xf32> to vector<1x256xf32>
    %15 = arith.mulf %13, %14 : vector<1x256xf32>
    %16 = arith.addf %12, %15 : vector<1x256xf32>
    %17 = vector.extract_strided_slice %5 {offsets = [3, 0], sizes = [1, 256], strides = [1, 1]} : vector<8x256xf32> to vector<1x256xf32>
    %18 = vector.extract_strided_slice %3 {offsets = [3, 0], sizes = [1, 256], strides = [1, 1]} : vector<4x256xf32> to vector<1x256xf32>
    %19 = arith.mulf %17, %18 : vector<1x256xf32>
    %20 = arith.addf %16, %19 : vector<1x256xf32>
    %c0_9 = arith.constant 0 : index
    %c0_10 = arith.constant 0 : index
    %21 = vector.load %arg5[%c0_9, %c0_10] : memref<2x1xf32, #tpu.memory_space<vmem>>, vector<1x1xf32>
    %22 = vector.broadcast %21 : vector<1x1xf32> to vector<1x256xf32>
    %23 = arith.addf %20, %22 : vector<1x256xf32>
    %24 = vector.extract_strided_slice %5 {offsets = [4, 0], sizes = [1, 256], strides = [1, 1]} : vector<8x256xf32> to vector<1x256xf32>
    %25 = vector.extract_strided_slice %3 {offsets = [0, 0], sizes = [1, 256], strides = [1, 1]} : vector<4x256xf32> to vector<1x256xf32>
    %26 = arith.mulf %24, %25 : vector<1x256xf32>
    %27 = vector.extract_strided_slice %5 {offsets = [5, 0], sizes = [1, 256], strides = [1, 1]} : vector<8x256xf32> to vector<1x256xf32>
    %28 = vector.extract_strided_slice %3 {offsets = [1, 0], sizes = [1, 256], strides = [1, 1]} : vector<4x256xf32> to vector<1x256xf32>
    %29 = arith.mulf %27, %28 : vector<1x256xf32>
    %30 = arith.addf %26, %29 : vector<1x256xf32>
    %31 = vector.extract_strided_slice %5 {offsets = [6, 0], sizes = [1, 256], strides = [1, 1]} : vector<8x256xf32> to vector<1x256xf32>
    %32 = vector.extract_strided_slice %3 {offsets = [2, 0], sizes = [1, 256], strides = [1, 1]} : vector<4x256xf32> to vector<1x256xf32>
    %33 = arith.mulf %31, %32 : vector<1x256xf32>
    %34 = arith.addf %30, %33 : vector<1x256xf32>
    %35 = vector.extract_strided_slice %5 {offsets = [7, 0], sizes = [1, 256], strides = [1, 1]} : vector<8x256xf32> to vector<1x256xf32>
    %36 = vector.extract_strided_slice %3 {offsets = [3, 0], sizes = [1, 256], strides = [1, 1]} : vector<4x256xf32> to vector<1x256xf32>
    %37 = arith.mulf %35, %36 : vector<1x256xf32>
    %38 = arith.addf %34, %37 : vector<1x256xf32>
    %c1 = arith.constant 1 : index
    %c0_11 = arith.constant 0 : index
    %39 = vector.load %arg5[%c1, %c0_11] : memref<2x1xf32, #tpu.memory_space<vmem>>, vector<1x1xf32>
    %40 = vector.broadcast %39 : vector<1x1xf32> to vector<1x256xf32>
    %41 = arith.addf %38, %40 : vector<1x256xf32>
    %42 = tpu.concatenate %1, %23, %41 in 0 : vector<2x256xf32>, vector<1x256xf32>, vector<1x256xf32> -> vector<4x256xf32>
    %c0_12 = arith.constant 0 : index
    %c0_13 = arith.constant 0 : index
    %43 = vector.load %arg6[%c0_12, %c0_13] : memref<8x36xf32, #tpu.memory_space<vmem>>, vector<8x36xf32>
    %c0_14 = arith.constant 0 : index
    %c0_15 = arith.constant 0 : index
    %44 = vector.load %arg7[%c0_14, %c0_15] : memref<8x1xf32, #tpu.memory_space<vmem>>, vector<8x1xf32>
    %c17_i32 = arith.constant 17 : i32
    %45 = tpu.dynamic_rotate %42 by %c17_i32 dim 1 : vector<4x256xf32>, i32 -> vector<4x256xf32>
    %46 = vector.extract_strided_slice %4 {offsets = [0, 0], sizes = [1, 256], strides = [1, 1]} : vector<9x256xf32> to vector<1x256xf32>
    %47 = vector.broadcast %46 : vector<1x256xf32> to vector<4x256xf32>
    %48 = arith.mulf %45, %47 : vector<4x256xf32>
    %c16_i32 = arith.constant 16 : i32
    %49 = tpu.dynamic_rotate %42 by %c16_i32 dim 1 : vector<4x256xf32>, i32 -> vector<4x256xf32>
    %50 = vector.extract_strided_slice %4 {offsets = [1, 0], sizes = [1, 256], strides = [1, 1]} : vector<9x256xf32> to vector<1x256xf32>
    %51 = vector.broadcast %50 : vector<1x256xf32> to vector<4x256xf32>
    %52 = arith.mulf %49, %51 : vector<4x256xf32>
    %c15_i32 = arith.constant 15 : i32
    %53 = tpu.dynamic_rotate %42 by %c15_i32 dim 1 : vector<4x256xf32>, i32 -> vector<4x256xf32>
    %54 = vector.extract_strided_slice %4 {offsets = [2, 0], sizes = [1, 256], strides = [1, 1]} : vector<9x256xf32> to vector<1x256xf32>
    %55 = vector.broadcast %54 : vector<1x256xf32> to vector<4x256xf32>
    %56 = arith.mulf %53, %55 : vector<4x256xf32>
    %c1_i32 = arith.constant 1 : i32
    %57 = tpu.dynamic_rotate %42 by %c1_i32 dim 1 : vector<4x256xf32>, i32 -> vector<4x256xf32>
    %58 = vector.extract_strided_slice %4 {offsets = [3, 0], sizes = [1, 256], strides = [1, 1]} : vector<9x256xf32> to vector<1x256xf32>
    %59 = vector.broadcast %58 : vector<1x256xf32> to vector<4x256xf32>
    %60 = arith.mulf %57, %59 : vector<4x256xf32>
    %c255_i32 = arith.constant 255 : i32
    %61 = tpu.dynamic_rotate %42 by %c255_i32 dim 1 : vector<4x256xf32>, i32 -> vector<4x256xf32>
    %62 = vector.extract_strided_slice %4 {offsets = [5, 0], sizes = [1, 256], strides = [1, 1]} : vector<9x256xf32> to vector<1x256xf32>
    %63 = vector.broadcast %62 : vector<1x256xf32> to vector<4x256xf32>
    %64 = arith.mulf %61, %63 : vector<4x256xf32>
    %c241_i32 = arith.constant 241 : i32
    %65 = tpu.dynamic_rotate %42 by %c241_i32 dim 1 : vector<4x256xf32>, i32 -> vector<4x256xf32>
    %66 = vector.extract_strided_slice %4 {offsets = [6, 0], sizes = [1, 256], strides = [1, 1]} : vector<9x256xf32> to vector<1x256xf32>
    %67 = vector.broadcast %66 : vector<1x256xf32> to vector<4x256xf32>
    %68 = arith.mulf %65, %67 : vector<4x256xf32>
    %c240_i32 = arith.constant 240 : i32
    %69 = tpu.dynamic_rotate %42 by %c240_i32 dim 1 : vector<4x256xf32>, i32 -> vector<4x256xf32>
    %70 = vector.extract_strided_slice %4 {offsets = [7, 0], sizes = [1, 256], strides = [1, 1]} : vector<9x256xf32> to vector<1x256xf32>
    %71 = vector.broadcast %70 : vector<1x256xf32> to vector<4x256xf32>
    %72 = arith.mulf %69, %71 : vector<4x256xf32>
    %c239_i32 = arith.constant 239 : i32
    %73 = tpu.dynamic_rotate %42 by %c239_i32 dim 1 : vector<4x256xf32>, i32 -> vector<4x256xf32>
    %74 = vector.extract_strided_slice %4 {offsets = [8, 0], sizes = [1, 256], strides = [1, 1]} : vector<9x256xf32> to vector<1x256xf32>
    %75 = vector.broadcast %74 : vector<1x256xf32> to vector<4x256xf32>
    %76 = arith.mulf %73, %75 : vector<4x256xf32>
    %77 = tpu.concatenate %48, %52, %56, %60, %42, %64, %68, %72, %76 in 0 : vector<4x256xf32>, vector<4x256xf32>, vector<4x256xf32>, vector<4x256xf32>, vector<4x256xf32>, vector<4x256xf32>, vector<4x256xf32>, vector<4x256xf32>, vector<4x256xf32> -> vector<36x256xf32>
    %cst = arith.constant dense<0.000000e+00> : vector<8x256xf32>
    %78 = tpu.matmul %43, %77, %cst {dimension_numbers = #tpu.dot_dimension_numbers<[1], [0], [0], [1], [0, 0, 1, 1], [], []>} : vector<8x36xf32>, vector<36x256xf32>, vector<8x256xf32> -> vector<8x256xf32>
    %79 = vector.broadcast %44 : vector<8x1xf32> to vector<8x256xf32>
    %80 = arith.addf %78, %79 : vector<8x256xf32>
    %cst_16 = arith.constant 0.000000e+00 : f32
    %81 = vector.broadcast %cst_16 : f32 to vector<8x256xf32>
    %82 = arith.maximumf %80, %81 : vector<8x256xf32>
    %c0_17 = arith.constant 0 : index
    %c0_18 = arith.constant 0 : index
    %83 = vector.load %arg8[%c0_17, %c0_18] : memref<8x72xf32, #tpu.memory_space<vmem>>, vector<8x72xf32>
    %c0_19 = arith.constant 0 : index
    %c0_20 = arith.constant 0 : index
    %84 = vector.load %arg9[%c0_19, %c0_20] : memref<8x1xf32, #tpu.memory_space<vmem>>, vector<8x1xf32>
    %c17_i32_21 = arith.constant 17 : i32
    %85 = tpu.dynamic_rotate %82 by %c17_i32_21 dim 1 : vector<8x256xf32>, i32 -> vector<8x256xf32>
    %86 = vector.extract_strided_slice %4 {offsets = [0, 0], sizes = [1, 256], strides = [1, 1]} : vector<9x256xf32> to vector<1x256xf32>
    %87 = vector.broadcast %86 : vector<1x256xf32> to vector<8x256xf32>
    %88 = arith.mulf %85, %87 : vector<8x256xf32>
    %c16_i32_22 = arith.constant 16 : i32
    %89 = tpu.dynamic_rotate %82 by %c16_i32_22 dim 1 : vector<8x256xf32>, i32 -> vector<8x256xf32>
    %90 = vector.extract_strided_slice %4 {offsets = [1, 0], sizes = [1, 256], strides = [1, 1]} : vector<9x256xf32> to vector<1x256xf32>
    %91 = vector.broadcast %90 : vector<1x256xf32> to vector<8x256xf32>
    %92 = arith.mulf %89, %91 : vector<8x256xf32>
    %c15_i32_23 = arith.constant 15 : i32
    %93 = tpu.dynamic_rotate %82 by %c15_i32_23 dim 1 : vector<8x256xf32>, i32 -> vector<8x256xf32>
    %94 = vector.extract_strided_slice %4 {offsets = [2, 0], sizes = [1, 256], strides = [1, 1]} : vector<9x256xf32> to vector<1x256xf32>
    %95 = vector.broadcast %94 : vector<1x256xf32> to vector<8x256xf32>
    %96 = arith.mulf %93, %95 : vector<8x256xf32>
    %c1_i32_24 = arith.constant 1 : i32
    %97 = tpu.dynamic_rotate %82 by %c1_i32_24 dim 1 : vector<8x256xf32>, i32 -> vector<8x256xf32>
    %98 = vector.extract_strided_slice %4 {offsets = [3, 0], sizes = [1, 256], strides = [1, 1]} : vector<9x256xf32> to vector<1x256xf32>
    %99 = vector.broadcast %98 : vector<1x256xf32> to vector<8x256xf32>
    %100 = arith.mulf %97, %99 : vector<8x256xf32>
    %c255_i32_25 = arith.constant 255 : i32
    %101 = tpu.dynamic_rotate %82 by %c255_i32_25 dim 1 : vector<8x256xf32>, i32 -> vector<8x256xf32>
    %102 = vector.extract_strided_slice %4 {offsets = [5, 0], sizes = [1, 256], strides = [1, 1]} : vector<9x256xf32> to vector<1x256xf32>
    %103 = vector.broadcast %102 : vector<1x256xf32> to vector<8x256xf32>
    %104 = arith.mulf %101, %103 : vector<8x256xf32>
    %c241_i32_26 = arith.constant 241 : i32
    %105 = tpu.dynamic_rotate %82 by %c241_i32_26 dim 1 : vector<8x256xf32>, i32 -> vector<8x256xf32>
    %106 = vector.extract_strided_slice %4 {offsets = [6, 0], sizes = [1, 256], strides = [1, 1]} : vector<9x256xf32> to vector<1x256xf32>
    %107 = vector.broadcast %106 : vector<1x256xf32> to vector<8x256xf32>
    %108 = arith.mulf %105, %107 : vector<8x256xf32>
    %c240_i32_27 = arith.constant 240 : i32
    %109 = tpu.dynamic_rotate %82 by %c240_i32_27 dim 1 : vector<8x256xf32>, i32 -> vector<8x256xf32>
    %110 = vector.extract_strided_slice %4 {offsets = [7, 0], sizes = [1, 256], strides = [1, 1]} : vector<9x256xf32> to vector<1x256xf32>
    %111 = vector.broadcast %110 : vector<1x256xf32> to vector<8x256xf32>
    %112 = arith.mulf %109, %111 : vector<8x256xf32>
    %c239_i32_28 = arith.constant 239 : i32
    %113 = tpu.dynamic_rotate %82 by %c239_i32_28 dim 1 : vector<8x256xf32>, i32 -> vector<8x256xf32>
    %114 = vector.extract_strided_slice %4 {offsets = [8, 0], sizes = [1, 256], strides = [1, 1]} : vector<9x256xf32> to vector<1x256xf32>
    %115 = vector.broadcast %114 : vector<1x256xf32> to vector<8x256xf32>
    %116 = arith.mulf %113, %115 : vector<8x256xf32>
    %117 = tpu.concatenate %88, %92, %96, %100, %82, %104, %108, %112, %116 in 0 : vector<8x256xf32>, vector<8x256xf32>, vector<8x256xf32>, vector<8x256xf32>, vector<8x256xf32>, vector<8x256xf32>, vector<8x256xf32>, vector<8x256xf32>, vector<8x256xf32> -> vector<72x256xf32>
    %cst_29 = arith.constant dense<0.000000e+00> : vector<8x256xf32>
    %118 = tpu.matmul %83, %117, %cst_29 {dimension_numbers = #tpu.dot_dimension_numbers<[1], [0], [0], [1], [0, 0, 1, 1], [], []>} : vector<8x72xf32>, vector<72x256xf32>, vector<8x256xf32> -> vector<8x256xf32>
    %119 = vector.broadcast %84 : vector<8x1xf32> to vector<8x256xf32>
    %120 = arith.addf %118, %119 : vector<8x256xf32>
    %cst_30 = arith.constant 0.000000e+00 : f32
    %121 = vector.broadcast %cst_30 : f32 to vector<8x256xf32>
    %122 = arith.maximumf %120, %121 : vector<8x256xf32>
    %c0_31 = arith.constant 0 : index
    %c0_32 = arith.constant 0 : index
    %c0_33 = arith.constant 0 : index
    %123 = vector.load %arg10[%c0_31, %c0_32, %c0_33] : memref<1x8x256xf32, #tpu.memory_space<vmem>>, vector<1x8x256xf32>
    %124 = vector.shape_cast %123 : vector<1x8x256xf32> to vector<8x256xf32>
    %125 = vector.shape_cast %122 : vector<8x256xf32> to vector<1x8x256xf32>
    tpu.vector_store %arg10[%c0_31, %c0_32, %c0_33], %125 {strides = array<i32>} : memref<1x8x256xf32, #tpu.memory_space<vmem>>, vector<1x8x256xf32>,
    return
  }
  func.func @transform_0(%arg0: i32) -> (i32, i32, i32) {
    %c0_i32 = arith.constant 0 : i32
    %c0_i32_0 = arith.constant 0 : i32
    %c0_i32_1 = arith.constant 0 : i32
    return %arg0, %c0_i32, %c0_i32_0 : i32, i32, i32
  }
  func.func @transform_1(%arg0: i32) -> (i32, i32, i32) {
    %c0_i32 = arith.constant 0 : i32
    %c0_i32_0 = arith.constant 0 : i32
    %c0_i32_1 = arith.constant 0 : i32
    return %arg0, %c0_i32, %c0_i32_0 : i32, i32, i32
  }
  func.func @transform_2(%arg0: i32) -> (i32, i32) {
    %c0_i32 = arith.constant 0 : i32
    %c0_i32_0 = arith.constant 0 : i32
    %c0_i32_1 = arith.constant 0 : i32
    return %c0_i32, %c0_i32_0 : i32, i32
  }
  func.func @transform_3(%arg0: i32) -> (i32, i32) {
    %c0_i32 = arith.constant 0 : i32
    %c0_i32_0 = arith.constant 0 : i32
    %c0_i32_1 = arith.constant 0 : i32
    return %c0_i32, %c0_i32_0 : i32, i32
  }
  func.func @transform_4(%arg0: i32) -> (i32, i32) {
    %c0_i32 = arith.constant 0 : i32
    %c0_i32_0 = arith.constant 0 : i32
    %c0_i32_1 = arith.constant 0 : i32
    return %c0_i32, %c0_i32_0 : i32, i32
  }
  func.func @transform_5(%arg0: i32) -> (i32, i32) {
    %c0_i32 = arith.constant 0 : i32
    %c0_i32_0 = arith.constant 0 : i32
    %c0_i32_1 = arith.constant 0 : i32
    return %c0_i32, %c0_i32_0 : i32, i32
  }
  func.func @transform_6(%arg0: i32) -> (i32, i32) {
    %c0_i32 = arith.constant 0 : i32
    %c0_i32_0 = arith.constant 0 : i32
    %c0_i32_1 = arith.constant 0 : i32
    return %c0_i32, %c0_i32_0 : i32, i32
  }
  func.func @transform_7(%arg0: i32) -> (i32, i32) {
    %c0_i32 = arith.constant 0 : i32
    %c0_i32_0 = arith.constant 0 : i32
    %c0_i32_1 = arith.constant 0 : i32
    return %c0_i32, %c0_i32_0 : i32, i32
  }
  func.func @transform_8(%arg0: i32) -> (i32, i32) {
    %c0_i32 = arith.constant 0 : i32
    %c0_i32_0 = arith.constant 0 : i32
    %c0_i32_1 = arith.constant 0 : i32
    return %c0_i32, %c0_i32_0 : i32, i32
  }
  func.func @transform_9(%arg0: i32) -> (i32, i32, i32) {
    %c0_i32 = arith.constant 0 : i32
    %c0_i32_0 = arith.constant 0 : i32
    %c0_i32_1 = arith.constant 0 : i32
    return %arg0, %c0_i32, %c0_i32_0 : i32, i32, i32
  }
}

</mosaic_0001>

<bundles_post_ra>
// kernel: upsample_forward.1
= control target key start
LH: loop header
LB: loop body
LE: loop exit
PB: predicated region body
PF: predicated region fallthrough
CT: control target
= control target key end

     0   :  { %s929_s30 = smov 0   ;;  %s1214_s0 = inlined_call_operand.vmem [shape: f32[2,2,256], index: 0, kind: input, shape index: {}]   ;;  %s1215_s1 = inlined_call_operand.vmem [shape: f32[2,4,256], index: 1, kind: input, shape index: {}]   ;;  %s1216_s2 = inlined_call_operand.vmem [shape: f32[9,256], index: 2, kind: input, shape index: {}]   ;;  %s1217_s3 = inlined_call_operand.vmem [shape: f32[8,256], index: 3, kind: input, shape index: {}]   ;;  %s1218_s4 = inlined_call_operand.vmem [shape: f32[2,1], index: 4, kind: input, shape index: {}]   ;;  %s1219_s5 = inlined_call_operand.vmem [shape: f32[8,36], index: 5, kind: input, shape index: {}]   ;;  %s1220_s6 = inlined_call_operand.vmem [shape: f32[8,1], index: 6, kind: input, shape index: {}]   ;;  %s1221_s7 = inlined_call_operand.vmem [shape: f32[8,72], index: 7, kind: input, shape index: {}]   ;;  %s1222_s8 = inlined_call_operand.vmem [shape: f32[8,1], index: 8, kind: input, shape index: {}]   ;;  %s1223_s9 = inlined_call_operand.vmem [shape: f32[2,8,256], index: 9, kind: output, shape index: {}]  }
   0x1 LB: > { %s819_s10 = sadd.s32 4294967295, %s868_s30   ;;  %p823_p0 = scmp.ge.s32.totalorder %s868_s30, 1  ;;  %s868_s30 = sphi %s929_s30, %s19_s30  }
   0x2   : > { %p297_p1 = scmp.lt.s32.totalorder %s868_s30, 3 }
   0x4   : > { %p298_p2 = pnand %p823_p0, %p297_p1 }
   0x5   : > { %p338_p3 = scmp.lt.s32.totalorder (!%p298_p2), %s819_s10, 1  ;;  %s871_s27 = smov (!%p298_p2), 127  }
   0x6   : > { %301 = sbr.rel (%p298_p2) target bundleno = 730 (0x2da), region = 56  ;;  %s872_s28 = smov (!%p298_p2), 111  }
   0x7   : > { %s873_s29 = smov (!%p298_p2), 112   ;;  %s874_s11 = smov (!%p298_p2), 113  }
   0x8   : > { %s875_s12 = smov (!%p298_p2), 16   ;;  %s876_s13 = smov (!%p298_p2), 15  }
   0x9   : > { %s877_s14 = smov (!%p298_p2), 1   ;;  %s878_s17 = smov (!%p298_p2), 17  }
   0xb   : > { %v418_v0 = vld [vmem:[%s1218_s4 + $0x1] sm:$0x1]  ;;  %v870_v1 = vmov 0   ;;  %v410_v2 = vld [vmem:[%s1218_s4] sm:$0x1]  ;;  %s1225_s10 = smov (!%p338_p3, %s819_s10), 1  ;;  %v457_v53 = vlaneseq }
   0xc   : > { %858 = vset.pattern.permute.xlu0 %v870_v1  ;;  %859 = vset.pattern.permute.xlu2 %v870_v1  ;;  %s838_s15 = sshll.u32 %s1225_s10, 2  ;;  %s839_s19 = sshll.u32 %s1225_s10, 3  ;;  %v359_v6 = vld [vmem:[%s1217_s3] sm:$0xff]  ;;  %v360_v11 = vld [vmem:[%s1217_s3 + $0x8] sm:$0xff]  ;;  %vm445_vm0 = vcmask 1041408   ;;  %vm448_vm1 = vcmask 1042432  }
   0xd   : > { %421 = vperm.xlu0 %858, %v418_v0   ;;  %s342_s18 = scalar_lea.vmem %s1214_s0, %s838_s15  ;;  %s347_s22 = scalar_lea.vmem %s1215_s1, %s839_s19  ;;  %v452_v52 = vld [vmem:[%s1220_s6] sm:$0xff]  ;;  %v1002_v55 = vand.u32 127, %v457_v53  ;;  %v1008_v56 = vld [vmem:[%s1216_s2 + $0x10] ss:$0 sm:$0xff]  ;;  %v1013_v57 = vld [vmem:[%s1216_s2 + $0x18] ss:$0 sm:$0xff] }
   0xe   : > { %v353_v3 = vld [vmem:[%s342_s18] sm:$0xf]  ;;  %vm567_vm3 = vcmask 1043456   ;;  %vm581_vm11 = vcmask 293888   ;;  %vm704_vm12 = vcmask 588800  }
   0xf   : > { %428 = vst [vmem:[#allocation1] ss:$4 sm:$0xff] %v353_v3  ;;  %v354_v4 = vld [vmem:[%s347_s22] sm:$0xff]  ;;  %vm536_vm2 = vcmp.lt.s32.totalorder %v1002_v55, 111  ;;  %vm514_vm4 = vcmp.lt.s32.totalorder %v1002_v55, 113  ;;  %vm525_vm5 = vcmp.lt.s32.totalorder %v1002_v55, 112 }
  0x10   : > { %v368_v5 = vperm.slane %v354_v4, 1  ;;  %v362_v7 = vperm.slane %v354_v4, 0  ;;  %v382_v9 = vperm.slane %v354_v4, 2  ;;  %v369_v10 = vperm.slane %v354_v4, 5  ;;  %v1026_v1 = vld [vmem:[%s1216_s2] sm:$0xff] }
  0x11   : > { %v396_v15 = vperm.slane %v354_v4, 3  ;;  %v363_v16 = vperm.slane %v354_v4, 4  ;;  %v383_v18 = vperm.slane %v354_v4, 6  ;;  %v397_v25 = vperm.slane %v354_v4, 7 }
  0x12   : > { %v372_v8 = vmul.f32 %v368_v5, %v359_v6  ;;  %v366_v12 = vmul.f32 %v362_v7, %v359_v6  ;;  %v386_v14 = vmul.f32 %v382_v9, %v359_v6  ;;  %v373_v17 = vmul.f32 %v369_v10, %v360_v11 }
  0x13   : > { %v400_v21 = vmul.f32 %v396_v15, %v359_v6  ;;  %v367_v22 = vmul.f32 %v363_v16, %v360_v11  ;;  %v387_v24 = vmul.f32 %v383_v18, %v360_v11  ;;  %v401_v31 = vmul.f32 %v397_v25, %v360_v11 }
  0x14   : > { %v376_v13 = vrot.slane %v372_v8, 1  ;;  %v390_v20 = vrot.slane %v386_v14, 2  ;;  %v377_v23 = vrot.slane %v373_v17, 1  ;;  %v528_v4 = vperm.slane %v1026_v1, 7 }
  0x15   : > { %413 = vperm.xlu0 %858, %v410_v2   ;;  %v404_v28 = vrot.slane %v400_v21, 3  ;;  %v391_v30 = vrot.slane %v387_v24, 2  ;;  %v405_v35 = vrot.slane %v401_v31, 3  ;;  %v1031_v2 = vld [vmem:[%s1216_s2 + $0x8] sm:$0xff]  ;;  %v517_v7 = vperm.slane %v1026_v1, 6 }
  0x16   : > { %v380_v19 = vadd.f32 %v376_v13, %v366_v12  ;;  %v381_v29 = vadd.f32 %v377_v23, %v367_v22  ;;  %v429_v40 = vld.sshfl [vmem:[#allocation1] sm:$0xff pattern:$0x73625140]  ;;  %v430_v48 = vld.sshfl [vmem:[#allocation1 + $0x8] sm:$0xff pattern:$0x73625140] }
  0x17   : > { %v529_v5 = vperm.slane %v1031_v2, 7  ;;  %v518_v8 = vperm.slane %v1031_v2, 6  ;;  %vm503_vm6 = vcmp.lt.s32.totalorder %v1002_v55, 127  ;;  %v506_v23 = vperm.slane %v1026_v1, 5 }
  0x18   : > { %v394_v27 = vadd.f32 %v390_v20, %v380_v19  ;;  %v395_v34 = vadd.f32 %v391_v30, %v381_v29  ;;  %v507_v24 = vperm.slane %v1031_v2, 5  ;;  %vm481_vm7 = vcmp.lt.s32.totalorder %v1002_v55, 15 }
  0x19   : > { %vm492_vm8 = vcmp.lt.s32.totalorder %v1002_v55, 1  ;;  %vm470_vm9 = vcmp.lt.s32.totalorder %v1002_v55, 16  ;;  %vm459_vm10 = vcmp.lt.s32.totalorder %v1002_v55, 17 }
  0x1a   : > { %v408_v32 = vadd.f32 %v404_v28, %v394_v27  ;;  %v409_v38 = vadd.f32 %v405_v35, %v395_v34  ;;  %v495_v35 = vperm.slane %v1026_v1, 3 }
  0x7f   : > { %v422_v26 = vpop.permute.xlu0 %421 }
  0x80   : > { %v423_v33 = vrot.slane %v422_v26, 4 }
  0x82   : > { %v425_v36 = vadd.f32 %v423_v33, %v408_v32  ;;  %v426_v47 = vadd.f32 %v423_v33, %v409_v38 }
  0x84   : > { %v441_v43 = vrot.slane %v425_v36, 1  ;;  %v442_v50 = vrot.slane %v426_v47, 1  ;;  %v496_v36 = vperm.slane %v1031_v2, 3 }
  0x87   : > { %v414_v37 = vpop.permute.xlu0 %413 }
  0x88   : > { %v416_v39 = vadd.f32 %v414_v37, %v408_v32  ;;  %v417_v41 = vadd.f32 %v414_v37, %v409_v38 }
  0x8a   : > { %v435_v42 = vrot.slane %v416_v39, 6  ;;  %v436_v46 = vrot.slane %v417_v41, 6  ;;  %v484_v39 = vperm.slane %v1026_v1, 2 }
  0x8c   : > { %v446_v44 = vsel %vm445_vm0, %v429_v40, %v435_v42  ;;  %v447_v49 = vsel %vm445_vm0, %v430_v48, %v436_v46  ;;  %v485_v40 = vperm.slane %v1031_v2, 2 }
  0x8d   : > { %v961_v45 = vsel %vm448_vm1, %v446_v44, %v441_v43  ;;  %v971_v51 = vsel %vm448_vm1, %v447_v49, %v442_v50 }
  0x8e   : > { %499 = vrot.lane.b32.xlu0 %v961_v45, %s871_s27  ;;  %532 = vrot.lane.b32.xlu2 %v961_v45, %s872_s28 }
  0x8f   : > { %521 = vrot.lane.b32.xlu1 %v961_v45, %s873_s29 }
  0x96   : > { %512 = vrot.lane.b32.xlu0 %v971_v51, %s874_s11  ;;  %534 = vrot.lane.b32.xlu2 %v971_v51, %s872_s28 }
  0x97   : > { %523 = vrot.lane.b32.xlu1 %v971_v51, %s873_s29 }
  0x9e   : > { %466 = vrot.lane.b32.xlu0 %v961_v45, %s875_s12  ;;  %510 = vrot.lane.b32.xlu2 %v961_v45, %s874_s11 }
  0x9f   : > { %501 = vrot.lane.b32.xlu1 %v971_v51, %s871_s27 }
  0xa6   : > { %479 = vrot.lane.b32.xlu0 %v971_v51, %s876_s13  ;;  %490 = vrot.lane.b32.xlu2 %v971_v51, %s877_s14 }
  0xa7   : > { %488 = vrot.lane.b32.xlu1 %v961_v45, %s877_s14 }
  0xae   : > { %578 = vperm.xlu0 %858, %v452_v52   ;;  %477 = vrot.lane.b32.xlu2 %v961_v45, %s876_s13 }
  0xaf   : > { %468 = vrot.lane.b32.xlu1 %v971_v51, %s875_s12 }
  0xb6   : > { %455 = vrot.lane.b32.xlu2 %v971_v51, %s878_s17 }
  0xb7   : > { %453 = vrot.lane.b32.xlu1 %v961_v45, %s878_s17 }
  0xe8   : > { %v533_v54 = vpop.permute.xlu2 %532 }
  0xf0   : > { %v535_v58 = vpop.permute.xlu2 %534 }
  0xf1   : > { %v537_v59 = vsel %vm536_vm2, %v533_v54, %v535_v58  ;;  %v538_v60 = vsel %vm536_vm2, %v535_v58, %v533_v54  ;;  %v473_v58 = vperm.slane %v1026_v1, 1 }
  0xf2   : > { %v541_v61 = vmul.f32 %v1008_v56, %v537_v59  ;;  %v542_v62 = vmul.f32 %v1013_v57, %v538_v60  ;;  %v474_v59 = vperm.slane %v1031_v2, 1 }
  0xf4   : > { %830 = vmatpush.msk.msra.mxu0 %vm567_vm3, %v541_v61  ;;  %832 = vmatpush.msk.msra.mxu1 %vm567_vm3, %v542_v62 }
  0xf8   : > { %v511_v3 = vpop.permute.xlu2 %510 }
 0x100   : > { %v500_v63 = vpop.permute.xlu0 %499  ;;  %v491_v20 = vpop.permute.xlu2 %490 }
 0x101   : > { %v522_v0 = vpop.permute.xlu1 %521 }
 0x108   : > { %v513_v6 = vpop.permute.xlu0 %512  ;;  %v478_v38 = vpop.permute.xlu2 %477 }
 0x109   : > { %v524_v9 = vpop.permute.xlu1 %523  ;;  %v515_v10 = vsel %vm514_vm4, %v511_v3, %v513_v6  ;;  %v516_v11 = vsel %vm514_vm4, %v513_v6, %v511_v3  ;;  %v463_v3 = vperm.slane %v1031_v2, 0 }
 0x10a   : > { %v526_v12 = vsel %vm525_vm5, %v522_v0, %v524_v9  ;;  %v527_v13 = vsel %vm525_vm5, %v524_v9, %v522_v0  ;;  %v519_v16 = vmul.f32 %v517_v7, %v515_v10  ;;  %v520_v17 = vmul.f32 %v518_v8, %v516_v11 }
 0x10b   : > { %v530_v14 = vmul.f32 %v528_v4, %v526_v12  ;;  %v531_v15 = vmul.f32 %v529_v5, %v527_v13  ;;  %v462_v0 = vperm.slane %v1026_v1, 0 }
 0x10d   : > { %v563_v18 = vrot.slane %v530_v14, 4  ;;  %v564_v19 = vrot.slane %v531_v15, 4 }
 0x10f   : > { %v574_v21 = vsel %vm567_vm3, %v519_v16, %v563_v18  ;;  %v575_v22 = vsel %vm567_vm3, %v520_v17, %v564_v19  ;;  %v451_v16 = vld [vmem:[%s1219_s5] sm:$0xff] }
 0x110   : > { %603 = vmatpush.msra.mxu0 %v574_v21  ;;  %623 = vmatpush.msra.mxu1 %v575_v22  ;;  %v467_v25 = vpop.permute.xlu0 %466  ;;  %v456_v6 = vpop.permute.xlu2 %455 }
 0x111   : > { %v502_v26 = vpop.permute.xlu1 %501 }
 0x112   : > { %v504_v27 = vsel %vm503_vm6, %v500_v63, %v502_v26  ;;  %v505_v28 = vsel %vm503_vm6, %v502_v26, %v500_v63 }
 0x113   : > { %v508_v29 = vmul.f32 %v506_v23, %v504_v27  ;;  %v509_v30 = vmul.f32 %v507_v24, %v505_v28 }
 0x115   : > { %v557_v31 = vrot.slane %v508_v29, 4  ;;  %v558_v32 = vrot.slane %v509_v30, 4 }
 0x117   : > { %v572_v33 = vsel %vm567_vm3, %v961_v45, %v557_v31  ;;  %v573_v34 = vsel %vm567_vm3, %v971_v51, %v558_v32 }
 0x118   : > { %604 = vmatpush.msra.mxu0 %v572_v33  ;;  %624 = vmatpush.msra.mxu1 %v573_v34  ;;  %v480_v37 = vpop.permute.xlu0 %479 }
 0x119   : > { %v489_v41 = vpop.permute.xlu1 %488  ;;  %v482_v42 = vsel %vm481_vm7, %v478_v38, %v480_v37  ;;  %v483_v43 = vsel %vm481_vm7, %v480_v37, %v478_v38 }
 0x11a   : > { %v493_v44 = vsel %vm492_vm8, %v489_v41, %v491_v20  ;;  %v494_v45 = vsel %vm492_vm8, %v491_v20, %v489_v41  ;;  %v486_v48 = vmul.f32 %v484_v39, %v483_v43  ;;  %v487_v49 = vmul.f32 %v485_v40, %v482_v42 }
 0x11b   : > { %v497_v46 = vmul.f32 %v495_v35, %v494_v45  ;;  %v498_v47 = vmul.f32 %v496_v36, %v493_v44 }
 0x11d   : > { %v551_v50 = vrot.slane %v497_v46, 4  ;;  %v552_v51 = vrot.slane %v498_v47, 4 }
 0x11f   : > { %v570_v52 = vsel %vm567_vm3, %v486_v48, %v551_v50  ;;  %v571_v53 = vsel %vm567_vm3, %v487_v49, %v552_v51  ;;  %v634_v49 = vld [vmem:[%s1222_s8] sm:$0xff] }
 0x120   : > { %605 = vmatpush.msra.mxu0 %v570_v52  ;;  %625 = vmatpush.msra.mxu1 %v571_v53  ;;  %v579_v19 = vpop.permute.xlu0 %578 }
 0x121   : > { %v469_v54 = vpop.permute.xlu1 %468 }
 0x122   : > { %v471_v60 = vsel %vm470_vm9, %v467_v25, %v469_v54  ;;  %v472_v61 = vsel %vm470_vm9, %v469_v54, %v467_v25 }
 0x123   : > { %v475_v62 = vmul.f32 %v473_v58, %v472_v61  ;;  %v476_v63 = vmul.f32 %v474_v59, %v471_v60 }
 0x125   : > { %v545_v12 = vrot.slane %v475_v62, 4  ;;  %v546_v13 = vrot.slane %v476_v63, 4 }
 0x129   : > { %v454_v9 = vpop.permute.xlu1 %453 }
 0x12a   : > { %v460_v10 = vsel %vm459_vm10, %v454_v9, %v456_v6  ;;  %v461_v11 = vsel %vm459_vm10, %v456_v6, %v454_v9 }
 0x12b   : > { %v464_v14 = vmul.f32 %v462_v0, %v461_v11  ;;  %v465_v15 = vmul.f32 %v463_v3, %v460_v10 }
 0x12d   : > { %v568_v17 = vsel %vm567_vm3, %v464_v14, %v545_v12  ;;  %v569_v18 = vsel %vm567_vm3, %v465_v15, %v546_v13 }
 0x12e   : > { %606 = vmatpush.msra.mxu0 %v568_v17  ;;  %626 = vmatpush.msra.mxu1 %v569_v18 }
 0x12f   : > { %831 = vmatmul.msk.f32.vlgmr.msra.gmra.mxu0 %vm581_vm11, %v451_v16  ;;  %833 = vmatmul.msk.f32.vlgmr.msra.gmra.mxu1 %vm581_vm11, %v451_v16 }
 0x1ac   : > { %v608_v20 = vpop.f32.mrf.mxu0  ;;  %v628_v21 = vpop.f32.mrf.mxu1 }
 0x1ad   : > { %v609_v22 = vadd.f32 %v608_v20, %v579_v19  ;;  %v629_v25 = vadd.f32 %v628_v21, %v579_v19 }
 0x1af   : > { %v631_v26 = vmax.f32 %v609_v22, 0.0  ;;  %v632_v27 = vmax.f32 %v629_v25, 0.0 }
 0x1b1   : > { %683 = vrot.lane.b32.xlu0 %v631_v26, %s873_s29  ;;  %691 = vrot.lane.b32.xlu1 %v631_v26, %s872_s28 }
 0x1b2   : > { %693 = vrot.lane.b32.xlu2 %v632_v27, %s872_s28 }
 0x1b9   : > { %677 = vrot.lane.b32.xlu0 %v632_v27, %s874_s11  ;;  %685 = vrot.lane.b32.xlu1 %v632_v27, %s873_s29 }
 0x1ba   : > { %675 = vrot.lane.b32.xlu2 %v631_v26, %s874_s11 }
 0x1c1   : > { %659 = vrot.lane.b32.xlu0 %v631_v26, %s877_s14  ;;  %667 = vrot.lane.b32.xlu1 %v631_v26, %s871_s27 }
 0x1c2   : > { %669 = vrot.lane.b32.xlu2 %v632_v27, %s871_s27 }
 0x1c9   : > { %653 = vrot.lane.b32.xlu0 %v632_v27, %s876_s13  ;;  %661 = vrot.lane.b32.xlu1 %v632_v27, %s877_s14 }
 0x1ca   : > { %651 = vrot.lane.b32.xlu2 %v631_v26, %s876_s13 }
 0x1d1   : > { %635 = vrot.lane.b32.xlu0 %v631_v26, %s878_s17  ;;  %643 = vrot.lane.b32.xlu1 %v631_v26, %s875_s12 }
 0x1d2   : > { %645 = vrot.lane.b32.xlu2 %v632_v27, %s875_s12  ;;  %s840_s12 = sshll.u32 %s1225_s10, 4 }
 0x1d3   : > { %s352_s16 = scalar_lea.vmem %s1223_s9, %s840_s12 }
 0x1d9   : > { %637 = vrot.lane.b32.xlu1 %v632_v27, %s878_s17 }
 0x1da   : > { %701 = vperm.xlu2 %859, %v634_v49  }
 0x20c   : > { %v694_v28 = vpop.permute.xlu2 %693 }
 0x214   : > { %v676_v33 = vpop.permute.xlu2 %675 }
 0x21c   : > { %v670_v46 = vpop.permute.xlu2 %669 }
 0x223   : > { %v684_v29 = vpop.permute.xlu0 %683  ;;  %v692_v30 = vpop.permute.xlu1 %691 }
 0x224   : > { %v695_v31 = vsel %vm536_vm2, %v692_v30, %v694_v28  ;;  %v696_v32 = vsel %vm536_vm2, %v694_v28, %v692_v30  ;;  %v652_v52 = vpop.permute.xlu2 %651 }
 0x225   : > { %v697_v34 = vmul.f32 %v1008_v56, %v695_v31  ;;  %v698_v37 = vmul.f32 %v1013_v57, %v696_v32 }
 0x227   : > { %715 = vmatpush.msra.mxu2 %v697_v34  ;;  %735 = vmatpush.msra.mxu3 %v698_v37 }
 0x22b   : > { %v678_v38 = vpop.permute.xlu0 %677  ;;  %v686_v41 = vpop.permute.xlu1 %685 }
 0x22c   : > { %v679_v42 = vsel %vm514_vm4, %v676_v33, %v678_v38  ;;  %v680_v43 = vsel %vm514_vm4, %v678_v38, %v676_v33  ;;  %v687_v44 = vsel %vm525_vm5, %v684_v29, %v686_v41  ;;  %v688_v45 = vsel %vm525_vm5, %v686_v41, %v684_v29  ;;  %v646_v10 = vpop.permute.xlu2 %645 }
 0x22d   : > { %v689_v56 = vmul.f32 %v687_v44, %v528_v4  ;;  %v690_v57 = vmul.f32 %v688_v45, %v529_v5  ;;  %v681_v47 = vmul.f32 %v679_v42, %v517_v7  ;;  %v682_v48 = vmul.f32 %v680_v43, %v518_v8 }
 0x22f   : > { %716 = vmatpush.msra.mxu2 %v689_v56  ;;  %736 = vmatpush.msra.mxu3 %v690_v57 }
 0x231   : > { %717 = vmatpush.msra.mxu2 %v681_v47  ;;  %737 = vmatpush.msra.mxu3 %v682_v48 }
 0x233   : > { %v660_v4 = vpop.permute.xlu0 %659  ;;  %v668_v50 = vpop.permute.xlu1 %667 }
 0x234   : > { %v671_v5 = vsel %vm503_vm6, %v668_v50, %v670_v46  ;;  %v672_v51 = vsel %vm503_vm6, %v670_v46, %v668_v50  ;;  %v702_v17 = vpop.permute.xlu2 %701 }
 0x235   : > { %v673_v7 = vmul.f32 %v671_v5, %v506_v23  ;;  %v674_v8 = vmul.f32 %v672_v51, %v507_v24 }
 0x237   : > { %718 = vmatpush.msra.mxu2 %v673_v7  ;;  %738 = vmatpush.msra.mxu3 %v674_v8 }
 0x239   : > { %719 = vmatpush.msra.mxu2 %v631_v26  ;;  %739 = vmatpush.msra.mxu3 %v632_v27 }
 0x23b   : > { %v654_v53 = vpop.permute.xlu0 %653  ;;  %v662_v54 = vpop.permute.xlu1 %661 }
 0x23c   : > { %v655_v60 = vsel %vm481_vm7, %v652_v52, %v654_v53  ;;  %v656_v61 = vsel %vm481_vm7, %v654_v53, %v652_v52  ;;  %v663_v62 = vsel %vm492_vm8, %v660_v4, %v662_v54  ;;  %v664_v23 = vsel %vm492_vm8, %v662_v54, %v660_v4 }
 0x23d   : > { %v665_v24 = vmul.f32 %v664_v23, %v495_v35  ;;  %v666_v63 = vmul.f32 %v663_v62, %v496_v36  ;;  %v657_v6 = vmul.f32 %v656_v61, %v484_v39  ;;  %v658_v9 = vmul.f32 %v655_v60, %v485_v40 }
 0x23f   : > { %720 = vmatpush.msra.mxu2 %v665_v24  ;;  %740 = vmatpush.msra.mxu3 %v666_v63 }
 0x241   : > { %721 = vmatpush.msra.mxu2 %v657_v6  ;;  %741 = vmatpush.msra.mxu3 %v658_v9 }
 0x243   : > { %v644_v11 = vpop.permute.xlu1 %643  ;;  %v636_v39 = vpop.permute.xlu0 %635 }
 0x244   : > { %v647_v12 = vsel %vm470_vm9, %v644_v11, %v646_v10  ;;  %v648_v35 = vsel %vm470_vm9, %v646_v10, %v644_v11 }
 0x245   : > { %v649_v36 = vmul.f32 %v648_v35, %v473_v58  ;;  %v650_v13 = vmul.f32 %v647_v12, %v474_v59  ;;  %v633_v59 = vld [vmem:[%s1221_s7] sm:$0xff] }
 0x247   : > { %722 = vmatpush.msra.mxu2 %v649_v36  ;;  %742 = vmatpush.msra.mxu3 %v650_v13 }
 0x24b   : > { %v638_v40 = vpop.permute.xlu1 %637 }
 0x24c   : > { %v639_v14 = vsel %vm459_vm10, %v636_v39, %v638_v40  ;;  %v640_v15 = vsel %vm459_vm10, %v638_v40, %v636_v39 }
 0x24d   : > { %v641_v16 = vmul.f32 %v640_v15, %v462_v0  ;;  %v642_v58 = vmul.f32 %v639_v14, %v463_v3 }
 0x24f   : > { %723 = vmatpush.msra.mxu2 %v641_v16  ;;  %743 = vmatpush.msra.mxu3 %v642_v58 }
 0x250   : > { %834 = vmatmul.msk.f32.vlgmr.msra.gmra.mxu2 %vm704_vm12, %v633_v59  ;;  %835 = vmatmul.msk.f32.vlgmr.msra.gmra.mxu3 %vm704_vm12, %v633_v59 }
 0x2d3   : > { %v725_v18 = vpop.f32.mrf.mxu2  ;;  %v745_v55 = vpop.f32.mrf.mxu3 }
 0x2d4   : > { %v726_v19 = vadd.f32 %v725_v18, %v702_v17  ;;  %v746_v20 = vadd.f32 %v745_v55, %v702_v17 }
 0x2d6   : > { %v748_v1 = vmax.f32 %v726_v19, 0.0  ;;  %v749_v2 = vmax.f32 %v746_v20, 0.0 }
 0x2d8   : > { %750 = vst [vmem:[%s352_s16] sm:$0xff] %v748_v1 }
 0x2d9   : > { %751 = vst [vmem:[%s352_s16 + $0x8] sm:$0xff] %v749_v2 }
 0x2da PF: > { %s19_s30 = sadd.s32 1, %s868_s30  }
 0x2db   : > { %p16_p4 = scmp.ge.s32.totalorder %s19_s30, 4  }
 0x2dd   :  { %18 = sbr.rel (!%p16_p4) target bundleno = 1 (0x1), region = 89 }

</bundles_post_ra>
